<compile_context>
chip_gen: v5e
topology: v5e:2x2
jax: 0.10.0
libtpu: 0.0.40
codegen_flags: <defaults>
</compile_context>

<pallas_src>
import math

import jax
import jax.numpy as jnp
from jax.experimental import pallas as pl
from jax.experimental.pallas import tpu as pltpu

LOG_STD_MIN = -6.0
LOG_STD_MAX = 1.0
SCALING = 0.5
TRANSLATION = 0.5
_HALF_LOG_2PI = 0.5 * math.log(2.0 * math.pi)
_LOG2 = math.log(2.0)


def _squash_and_logp(x, log_prob_elem):
    """Shared epilogue: tanh-squash + affine map + fused single reduction.

    Shares one exp(-2|x|) between tanh and the softplus-based squash
    correction (numerically stable |x| form):
        tanh(x)       = sign(x) * (1 - t) / (1 + t)
        softplus(-2x) = max(-2x, 0) + log(1 + t)       with t = exp(-2|x|)
    """
    t = jnp.exp(-2.0 * jnp.abs(x))                       # single shared EUP exp
    one_p_t = 1.0 + t
    softplus_m2x = jnp.maximum(-2.0 * x, 0.0) + jnp.log(one_p_t)
    corr = 2.0 * (_LOG2 - x - softplus_m2x)
    # Fused single cross-lane reduction (one XLU chain instead of two).
    logp = jnp.sum(log_prob_elem - corr, axis=-1, keepdims=True)
    sgn = jnp.where(x >= 0.0, 1.0, -1.0)
    tanh_x = sgn * (1.0 - t) / one_p_t
    y = tanh_x * SCALING + TRANSLATION
    return y, logp


def _kernel_stochastic(mu_ref, log_std_ref, eps_ref, x_ref, logp_ref):
    mu = mu_ref[...].astype(jnp.float32)
    log_std = jnp.clip(log_std_ref[...].astype(jnp.float32),
                       LOG_STD_MIN, LOG_STD_MAX)
    eps = eps_ref[...].astype(jnp.float32)
    std = jnp.exp(log_std)                               # only needed here
    x = mu + std * eps                                   # dist.rsample()
    # Normal(mu, std).log_prob(x), with z = (x - mu)/std == eps.
    log_prob = -0.5 * eps * eps - log_std - _HALF_LOG_2PI
    y, logp = _squash_and_logp(x, log_prob)
    x_ref[...] = y.astype(x_ref.dtype)
    logp_ref[...] = logp.astype(logp_ref.dtype)


def _kernel_deterministic(mu_ref, log_std_ref, x_ref, logp_ref):
    mu = mu_ref[...].astype(jnp.float32)
    log_std = jnp.clip(log_std_ref[...].astype(jnp.float32),
                       LOG_STD_MIN, LOG_STD_MAX)
    x = mu                                               # x == mu -> z == 0
    log_prob = -log_std - _HALF_LOG_2PI                  # no exp(log_std) needed
    y, logp = _squash_and_logp(x, log_prob)
    x_ref[...] = y.astype(x_ref.dtype)
    logp_ref[...] = logp.astype(logp_ref.dtype)


def diag_gaussian_alphas(params, eps=None, *, deterministic=False, tile_b=None):
    """params: (B, 2*D); eps: (B, D) standard normal noise (stochastic only)."""
    B, two_d = params.shape
    assert two_d % 2 == 0
    D = two_d // 2

    # Wrapper-side split (layout plumbing): mu / log_std each lane-0 aligned.
    mu = params[:, :D]
    log_std = params[:, D:]

    # Batch tiling: whole array for small B; 1024-row (8-aligned) tiles for
    # large B so Pallas can double-buffer the HBM->VMEM DMAs.  1024*D*f32
    # tiles stay far below the 32 MiB scoped-VMEM default on all generations
    # (including v7x's 64 MiB physical VMEM).
    if tile_b is None:
        tile_b = B if B <= 1024 else 1024
    grid = (pl.cdiv(B, tile_b),)

    io_spec = pl.BlockSpec((tile_b, D), lambda i: (i, 0))
    logp_spec = pl.BlockSpec((tile_b, 1), lambda i: (i, 0))

    out_shape = (
        jax.ShapeDtypeStruct((B, D), params.dtype),
        jax.ShapeDtypeStruct((B, 1), params.dtype),
    )
    compiler_params = pltpu.CompilerParams(dimension_semantics=("parallel",))

    if deterministic:
        # eps is dead code in this path: do not DMA it at all.
        return pl.pallas_call(
            _kernel_deterministic,
            out_shape=out_shape,
            grid_spec=pl.GridSpec(
                grid=grid,
                in_specs=[io_spec, io_spec],
                out_specs=[io_spec, logp_spec],
            ),
            compiler_params=compiler_params,
        )(mu, log_std)

    assert eps is not None and eps.shape == (B, D)
    return pl.pallas_call(
        _kernel_stochastic,
        out_shape=out_shape,
        grid_spec=pl.GridSpec(
            grid=grid,
            in_specs=[io_spec, io_spec, io_spec],
            out_specs=[io_spec, logp_spec],
        ),
        compiler_params=compiler_params,
    )(mu, log_std, eps)


def _reference(params, eps, deterministic=False):
    """Pure-JAX reference mirroring the PyTorch forward, for verification."""
    D = params.shape[-1] // 2
    mu, log_std = params[:, :D], params[:, D:]
    log_std = jnp.clip(log_std, LOG_STD_MIN, LOG_STD_MAX)
    std = jnp.exp(log_std)
    x = mu if deterministic else mu + std * eps
    log_prob = -0.5 * ((x - mu) / std) ** 2 - log_std - _HALF_LOG_2PI
    logp = jnp.sum(log_prob, axis=-1, keepdims=True)
    logp = logp - jnp.sum(2.0 * (_LOG2 - x - jax.nn.softplus(-2.0 * x)),
                          axis=1, keepdims=True)
    y = jnp.tanh(x) * SCALING + TRANSLATION
    return y, logp


if __name__ == "__main__":
    key = jax.random.PRNGKey(0)
    B, D = 8, 16  # small shapes: batch=8, action dim=16 -> params (8, 32)
    k1, k2 = jax.random.split(key)
    params = jax.random.normal(k1, (B, 2 * D), dtype=jnp.float32)
    eps = jax.random.normal(k2, (B, D), dtype=jnp.float32)

    # stochastic path (rsample)
    x, logp = diag_gaussian_alphas(params, eps, deterministic=False)
    jax.block_until_ready((x, logp))
    x_ref, logp_ref = _reference(params, eps, deterministic=False)
    assert jnp.allclose(x, x_ref, atol=1e-5, rtol=1e-5)
    assert jnp.allclose(logp, logp_ref, atol=1e-4, rtol=1e-4)

    # deterministic path (x = mu); eps is not passed / not DMA'd
    xd, logpd = diag_gaussian_alphas(params, deterministic=True)
    jax.block_until_ready((xd, logpd))
    xd_ref, logpd_ref = _reference(params, eps, deterministic=True)
    assert jnp.allclose(xd, xd_ref, atol=1e-5, rtol=1e-5)
    assert jnp.allclose(logpd, logpd_ref, atol=1e-4, rtol=1e-4)

    print("KERNEL_OK")
</pallas_src>

<mosaic_0001>
module attributes {stable_mosaic.version = 11 : i64} {
  func.func @_kernel_stochastic(%arg0: i32, %arg1: memref<8x16xf32, #tpu.memory_space<vmem>>, %arg2: memref<8x16xf32, #tpu.memory_space<vmem>>, %arg3: memref<8x16xf32, #tpu.memory_space<vmem>>, %arg4: memref<8x16xf32, #tpu.memory_space<vmem>>, %arg5: memref<8x1xf32, #tpu.memory_space<vmem>>) attributes {dimension_semantics = [#tpu.dimension_semantics<parallel>], iteration_bounds = array<i64: 1>, scalar_prefetch = 0 : i64, scratch_operands = 0 : i64, tpu.core_type = #tpu.core_type<tc>, window_params = [{transform_indices = @transform_0, window_bounds = array<i64: 8, 16>}, {transform_indices = @transform_1, window_bounds = array<i64: 8, 16>}, {transform_indices = @transform_2, window_bounds = array<i64: 8, 16>}, {transform_indices = @transform_3, window_bounds = array<i64: 8, 16>}, {transform_indices = @transform_4, window_bounds = array<i64: 8, 1>}]} {
    %c0 = arith.constant 0 : index
    %c0_0 = arith.constant 0 : index
    %0 = vector.load %arg1[%c0, %c0_0] : memref<8x16xf32, #tpu.memory_space<vmem>>, vector<8x16xf32>
    %c0_1 = arith.constant 0 : index
    %c0_2 = arith.constant 0 : index
    %1 = vector.load %arg2[%c0_1, %c0_2] : memref<8x16xf32, #tpu.memory_space<vmem>>, vector<8x16xf32>
    %cst = arith.constant -6.000000e+00 : f32
    %cst_3 = arith.constant 1.000000e+00 : f32
    %2 = vector.broadcast %cst : f32 to vector<8x16xf32>
    %3 = arith.maximumf %2, %1 : vector<8x16xf32>
    %4 = vector.broadcast %cst_3 : f32 to vector<8x16xf32>
    %5 = arith.minimumf %4, %3 : vector<8x16xf32>
    %c0_4 = arith.constant 0 : index
    %c0_5 = arith.constant 0 : index
    %6 = vector.load %arg3[%c0_4, %c0_5] : memref<8x16xf32, #tpu.memory_space<vmem>>, vector<8x16xf32>
    %7 = math.exp %5 : vector<8x16xf32>
    %8 = arith.mulf %7, %6 : vector<8x16xf32>
    %9 = arith.addf %0, %8 : vector<8x16xf32>
    %cst_6 = arith.constant -5.000000e-01 : f32
    %10 = vector.broadcast %cst_6 : f32 to vector<8x16xf32>
    %11 = arith.mulf %10, %6 : vector<8x16xf32>
    %12 = arith.mulf %11, %6 : vector<8x16xf32>
    %13 = arith.subf %12, %5 : vector<8x16xf32>
    %cst_7 = arith.constant 0.918938517 : f32
    %14 = vector.broadcast %cst_7 : f32 to vector<8x16xf32>
    %15 = arith.subf %13, %14 : vector<8x16xf32>
    %16 = math.absf %9 : vector<8x16xf32>
    %cst_8 = arith.constant -2.000000e+00 : f32
    %17 = vector.broadcast %cst_8 : f32 to vector<8x16xf32>
    %18 = arith.mulf %17, %16 : vector<8x16xf32>
    %19 = math.exp %18 : vector<8x16xf32>
    %cst_9 = arith.constant 1.000000e+00 : f32
    %20 = vector.broadcast %cst_9 : f32 to vector<8x16xf32>
    %21 = arith.addf %20, %19 : vector<8x16xf32>
    %cst_10 = arith.constant -2.000000e+00 : f32
    %22 = vector.broadcast %cst_10 : f32 to vector<8x16xf32>
    %23 = arith.mulf %22, %9 : vector<8x16xf32>
    %cst_11 = arith.constant 0.000000e+00 : f32
    %24 = vector.broadcast %cst_11 : f32 to vector<8x16xf32>
    %25 = arith.maximumf %23, %24 : vector<8x16xf32>
    %26 = math.log %21 : vector<8x16xf32>
    %27 = arith.addf %25, %26 : vector<8x16xf32>
    %cst_12 = arith.constant 0.693147182 : f32
    %28 = vector.broadcast %cst_12 : f32 to vector<8x16xf32>
    %29 = arith.subf %28, %9 : vector<8x16xf32>
    %30 = arith.subf %29, %27 : vector<8x16xf32>
    %cst_13 = arith.constant 2.000000e+00 : f32
    %31 = vector.broadcast %cst_13 : f32 to vector<8x16xf32>
    %32 = arith.mulf %31, %30 : vector<8x16xf32>
    %33 = arith.subf %15, %32 : vector<8x16xf32>
    %cst_14 = arith.constant dense<0.000000e+00> : vector<8xf32>
    %34 = vector.multi_reduction <add>, %33, %cst_14 [1] : vector<8x16xf32> to vector<8xf32>
    %35 = vector.shape_cast %34 : vector<8xf32> to vector<8x1xf32>
    %cst_15 = arith.constant 0.000000e+00 : f32
    %36 = vector.broadcast %cst_15 : f32 to vector<8x16xf32>
    %37 = arith.cmpf oge, %9, %36 : vector<8x16xf32>
    %cst_16 = arith.constant 1.000000e+00 : f32
    %cst_17 = arith.constant -1.000000e+00 : f32
    %38 = vector.broadcast %cst_16 : f32 to vector<8x16xf32>
    %39 = vector.broadcast %cst_17 : f32 to vector<8x16xf32>
    %40 = arith.select %37, %38, %39 : vector<8x16xi1>, vector<8x16xf32>
    %cst_18 = arith.constant 1.000000e+00 : f32
    %41 = vector.broadcast %cst_18 : f32 to vector<8x16xf32>
    %42 = arith.subf %41, %19 : vector<8x16xf32>
    %43 = arith.mulf %40, %42 : vector<8x16xf32>
    %44 = arith.divf %43, %21 : vector<8x16xf32>
    %cst_19 = arith.constant 5.000000e-01 : f32
    %45 = vector.broadcast %cst_19 : f32 to vector<8x16xf32>
    %46 = arith.mulf %44, %45 : vector<8x16xf32>
    %cst_20 = arith.constant 5.000000e-01 : f32
    %47 = vector.broadcast %cst_20 : f32 to vector<8x16xf32>
    %48 = arith.addf %46, %47 : vector<8x16xf32>
    %c0_21 = arith.constant 0 : index
    %c0_22 = arith.constant 0 : index
    %49 = vector.load %arg4[%c0_21, %c0_22] : memref<8x16xf32, #tpu.memory_space<vmem>>, vector<8x16xf32>
    tpu.vector_store %arg4[%c0_21, %c0_22], %48 {strides = array<i32>} : memref<8x16xf32, #tpu.memory_space<vmem>>, vector<8x16xf32>,
    %c0_23 = arith.constant 0 : index
    %c0_24 = arith.constant 0 : index
    %50 = vector.load %arg5[%c0_23, %c0_24] : memref<8x1xf32, #tpu.memory_space<vmem>>, vector<8x1xf32>
    tpu.vector_store %arg5[%c0_23, %c0_24], %35 {strides = array<i32>} : memref<8x1xf32, #tpu.memory_space<vmem>>, vector<8x1xf32>,
    return
  }
  func.func @transform_0(%arg0: i32) -> (i32, i32) {
    %c0_i32 = arith.constant 0 : i32
    %c0_i32_0 = arith.constant 0 : i32
    return %arg0, %c0_i32 : i32, i32
  }
  func.func @transform_1(%arg0: i32) -> (i32, i32) {
    %c0_i32 = arith.constant 0 : i32
    %c0_i32_0 = arith.constant 0 : i32
    return %arg0, %c0_i32 : i32, i32
  }
  func.func @transform_2(%arg0: i32) -> (i32, i32) {
    %c0_i32 = arith.constant 0 : i32
    %c0_i32_0 = arith.constant 0 : i32
    return %arg0, %c0_i32 : i32, i32
  }
  func.func @transform_3(%arg0: i32) -> (i32, i32) {
    %c0_i32 = arith.constant 0 : i32
    %c0_i32_0 = arith.constant 0 : i32
    return %arg0, %c0_i32 : i32, i32
  }
  func.func @transform_4(%arg0: i32) -> (i32, i32) {
    %c0_i32 = arith.constant 0 : i32
    %c0_i32_0 = arith.constant 0 : i32
    return %arg0, %c0_i32 : i32, i32
  }
}

</mosaic_0001>

<bundles_post_ra>
// kernel: tpu_custom_call.1
= control target key start
LH: loop header
LB: loop body
LE: loop exit
PB: predicated region body
PF: predicated region fallthrough
CT: control target
= control target key end

     0   :  { %10 = vsyncpa [#allocation3], 0  ;;  %s298_s0 = inlined_call_operand.hbm [shape: f32[8,16], index: 0, kind: input, shape index: {}]   ;;  %s299_s1 = inlined_call_operand.hbm [shape: f32[8,16], index: 1, kind: input, shape index: {}]   ;;  %s300_s2 = inlined_call_operand.hbm [shape: f32[8,16], index: 2, kind: input, shape index: {}]   ;;  %s301_s3 = inlined_call_operand.hbm [shape: f32[8,16], index: 3, kind: output, shape index: {0}]   ;;  %s302_s4 = inlined_call_operand.vmem [shape: f32[8,1], index: 4, kind: output, shape index: {1}]  }
   0x1   :  { %11 = vsyncpa [#allocation6], 0  ;;  %s29_s17 = sshll.u32 %s299_s1, 4  ;;  %s30_s17 = int_to_ptr.hbm [resolvable:$true] %s29_s17 }
   0x2   :  { %12 = vsyncpa [#allocation4], 0  ;;  %s251_s18 = smov [#allocation5]   ;;  %s18_s22 = sshll.u32 %s298_s0, 4  ;;  %s19_s22 = int_to_ptr.hbm [resolvable:$true] %s18_s22 }
   0x3   :  { %s31_s19 = sshll.u32 %s251_s18, 4  ;;  %s252_s23 = smov [#allocation2]   ;;  %s32_s19 = int_to_ptr.vmem [resolvable:$true] %s31_s19 }
   0x4   :  { %34 = dma.hbm_to_vmem [thread:$0]  %s30_s17, 128, %s32_s19, [#allocation6]  }
   0x5   :  { %s20_s24 = sshll.u32 %s252_s23, 4  ;;  %s40_s27 = sshll.u32 %s300_s2, 4  ;;  %s21_s24 = int_to_ptr.vmem [resolvable:$true] %s20_s24  ;;  %s41_s27 = int_to_ptr.hbm [resolvable:$true] %s40_s27 }
   0x6   :  { %23 = dma.hbm_to_vmem [thread:$0]  %s19_s22, 128, %s21_s24, [#allocation3]  }
   0x7   :  { %s253_s1 = smov [#allocation7]  }
   0x8   :  { %s42_s28 = sshll.u32 %s253_s1, 4  ;;  %s43_s28 = int_to_ptr.vmem [resolvable:$true] %s42_s28 }
   0x9   :  { %45 = dma.hbm_to_vmem [thread:$0]  %s41_s27, 128, %s43_s28, [#allocation6]  }
   0xa   :  { %245 = dma.done.wait [#allocation3], 128  }
   0xb   :  { %246 = vsyncadd [#allocation3], 4294967168 }
   0xc   :  { %247 = dma.done.wait [#allocation6], 256  }
   0xd   :  { %248 = vsyncadd [#allocation6], 4294967040  ;;  %v59_v0 = vld [vmem:[#allocation5] sm:$0xff]  ;;  %v62_v4 = vld [vmem:[#allocation7] sm:$0xff]  ;;  %v254_v31 = vmov -1.0   ;;  %vm85_vm4 = vcmask 130048  }
   0xe   :  { %v60_v1 = vmax.f32 %v59_v0, -6.0  ;;  %v58_v6 = vld [vmem:[#allocation2] sm:$0xff]  ;;  %v67_v14 = vmul.f32 -0.5, %v62_v4  ;;  %s255_s0 = smov [#allocation8]   ;;  %s120_s5 = sshll.u32 %s301_s3, 4  ;;  %vm111_vm6 = vcmask 7168   ;;  %s121_s5 = int_to_ptr.hbm [resolvable:$true] %s120_s5 }
   0xf   :  { %s118_s2 = sshll.u32 %s255_s0, 4  ;;  %s119_s2 = int_to_ptr.vmem [resolvable:$true] %s118_s2 }
  0x10   :  { %v61_v2 = vmin.f32 %v60_v1, 1.0  ;;  %v68_v16 = vmul.f32 %v67_v14, %v62_v4 }
  0x12   :  { %v63_v3 = vmul.f32 1.442695, %v61_v2  ;;  %v69_v20 = vsub.f32 %v68_v16, %v61_v2 }
  0x14   :  { %141 = vpow2.f32 %v63_v3  ;;  %v135_v29 = vadd.f32 -0.9189385, %v69_v20 }
  0x1a   :  { %v142_v5 = vpop.eup %141 }
  0x1b   :  { %v65_v7 = vmul.f32 %v142_v5, %v62_v4 }
  0x1d   :  { %v66_v8 = vadd.f32 %v65_v7, %v58_v6 }
  0x1f   :  { %v71_v9 = vand.u32 2147483647, %v66_v8  ;;  %v76_v15 = vmul.f32 -2.0, %v66_v8  ;;  %v81_v22 = vsub.f32 0.6931472, %v66_v8  ;;  %vm89_vm0 = vcmp.ge.f32.partialorder %v66_v8, 0.0 }
  0x20   :  { %v90_v32 = vsel %vm89_vm0, 1.0, %v254_v31 }
  0x21   :  { %v72_v10 = vmul.f32 -2.0, %v71_v9  ;;  %v77_v17 = vmax.f32 %v76_v15, 0.0 }
  0x23   :  { %v73_v11 = vmul.f32 1.442695, %v72_v10 }
  0x25   :  { %143 = vpow2.f32 %v73_v11 }
  0x2b   :  { %v144_v12 = vpop.eup %143 }
  0x2c   :  { %v75_v13 = vadd.f32 1.0, %v144_v12  ;;  %v91_v25 = vsub.f32 1.0, %v144_v12 }
  0x2e   :  { %145 = vlog2.f32 %v75_v13  ;;  %v104_v26 = vand.u32 2147483648, %v75_v13  ;;  %vm98_vm1 = vweird.f32 %v75_v13  ;;  %v102_v28 = vand.u32 2147483647, %v75_v13 }
  0x2f   :  { %147 = vrcp.f32 %v75_v13  ;;  %v92_v36 = vmul.f32 %v91_v25, %v90_v32 }
  0x30   :  { %v105_v35 = vor.u32 1.1754944e-38, %v104_v26  ;;  %vm103_vm5 = vcmp.eq.f32.partialorder %v102_v28, 8.507059e+37 }
  0x34   :  { %v146_v18 = vpop.eup %145 }
  0x35   :  { %v148_v19 = vpop.eup %147  ;;  %v79_v21 = vmul.f32 0.6931472, %v146_v18 }
  0x36   :  { %v94_v23 = vmul.f32 %v148_v19, %v75_v13  ;;  %vm99_vm2 = vweird.f32 %v148_v19 }
  0x37   :  { %v80_v24 = vadd.f32 %v79_v21, %v77_v17  ;;  %vm100_vm3 = vmor %vm98_vm1, %vm99_vm2 }
  0x38   :  { %v95_v27 = vsub.f32 1.0, %v94_v23 }
  0x39   :  { %v82_v30 = vsub.f32 %v81_v22, %v80_v24 }
  0x3a   :  { %v96_v33 = vmul.f32 %v148_v19, %v95_v27 }
  0x3b   :  { %v83_v34 = vmul.f32 2.0, %v82_v30 }
  0x3c   :  { %v97_v37 = vadd.f32 %v148_v19, %v96_v33 }
  0x3d   :  { %v84_v38 = vsub.f32 %v135_v29, %v83_v34 }
  0x3e   :  { %v101_v39 = vsel %vm100_vm3, %v148_v19, %v97_v37 }
  0x3f   :  { %v86_v40 = vsel %vm85_vm4, %v84_v38, 0.0  ;;  %v106_v41 = vsel %vm103_vm5, %v105_v35, %v101_v39 }
  0x40   :  { %87 = vadd.xlane.f32.xlu0 %v86_v40  ;;  %v107_v42 = vmul.f32 %v106_v41, %v92_v36 }
  0x42   :  { %v108_v43 = vmul.f32 0.5, %v107_v42 }
  0x44   :  { %v109_v44 = vadd.f32 0.5, %v108_v43 }
  0x46   :  { %110 = vst.msk [vmem:[#allocation8] sm:$0xff] %vm85_vm4, %v109_v44 }
  0x47   :  { %123 = dma.vmem_to_hbm [thread:$0]  %s119_s2, 128, %s121_s5, [#allocation4]  }
  0xb3   :  { %v88_v45 = vpop.xlane.xlu0 %87 }
  0xb4   :  { %112 = vst.msk [vmem:[%s302_s4] sm:$0xff] %vm111_vm6, %v88_v45 }
  0xb5   :  { %249 = dma.done.wait [#allocation4], 128  }
  0xb6   :  { %250 = vsyncadd [#allocation4], 4294967168 }
  0xb7   :  { %132 = vsyncpa [#allocation3], 1 }
  0xb8   :  { %133 = vsyncpa [#allocation6], 1 }
  0xb9   :  { %134 = vsyncpa [#allocation4], 1 }

</bundles_post_ra>
